<compile_context>
chip_gen: v6e
topology: v6e:2x2x1
jax: 0.10.0
libtpu: 0.0.40
codegen_flags: <defaults>
</compile_context>

<pallas_src>
import jax
import jax.numpy as jnp
from jax import lax
from jax.experimental import pallas as pl
from jax.experimental.pallas import tpu as pltpu
import numpy as np


def _round_up(x, m):
    return (x + m - 1) // m * m


def _cdiv(a, b):
    return -(-a // b)


def _make_conv_stats_kernel(TM, M, rows_per_core, has_partial):
    """Pass 1: conv tile (one MXU contraction) + stable per-core batch stats.

    Grid is (NC, n_per_core): axis 0 is 'parallel' (per-TensorCore partials on
    v7x), axis 1 is 'arbitrary' (Chan merge across that core's row tiles).
    mean_ref / m2_ref are (8, Cp) blocks (sublane-aligned); every sublane
    carries the same value and the wrapper reads row 0."""

    def kernel(p_ref, w_ref, y_ref, mean_ref, m2_ref):
        c = pl.program_id(0)
        i = pl.program_id(1)

        # ---- convolution tile: (TM, Kp) @ (Kp, Cp) -> f32 on the MXU ----
        y = jnp.dot(p_ref[...], w_ref[...], preferred_element_type=jnp.float32)
        y_ref[...] = y.astype(y_ref.dtype)       # bf16 store on the bf16 path

        @pl.when(i == 0)
        def _():
            mean_ref[...] = jnp.zeros_like(mean_ref)
            m2_ref[...] = jnp.zeros_like(m2_ref)

        # Valid-row bookkeeping (closed form, so no carried scalar state).
        start_c = c * rows_per_core
        na_i = jnp.clip(M - start_c, 0, i * TM)           # rows already merged
        nb_i = jnp.clip(M - (start_c + i * TM), 0, TM)    # valid rows this tile

        def merge(tile_mean, tile_m2, nb_f):
            # Chan merge of (mean, M2) — numerically stable, handles nb=0.
            na_f = na_i.astype(jnp.float32)
            tot = jnp.maximum(na_f + nb_f, 1.0)
            delta = tile_mean - mean_ref[...]
            mean_ref[...] = mean_ref[...] + delta * (nb_f / tot)
            m2_ref[...] = m2_ref[...] + tile_m2 + delta * delta * (na_f * nb_f / tot)

        ones_row = jnp.ones((1, TM), jnp.float32)

        def full_tile():
            # Fast path: no masks, constant 1/TM.  Row sums ride the MXU
            # (this layer class is memory-/VPU-bound; for large-K MXU-bound
            # layers switch these to jnp.sum on the XLU).
            tile_sum = jnp.dot(ones_row, y, preferred_element_type=jnp.float32)
            tile_mean = tile_sum * (1.0 / TM)
            yc = y - tile_mean
            tile_m2 = jnp.dot(ones_row, yc * yc,
                              preferred_element_type=jnp.float32)
            merge(tile_mean, tile_m2, float(TM))

        if not has_partial:
            full_tile()                                   # statically all-full
        else:
            @pl.when(nb_i == TM)
            def _():
                full_tile()

            @pl.when(nb_i < TM)
            def _():
                # Masked path: only for the partial tile / padded empty tiles.
                nb_f = nb_i.astype(jnp.float32)
                nb_safe = jnp.maximum(nb_f, 1.0)
                mask_row = (lax.broadcasted_iota(jnp.int32, (1, TM), 1) < nb_i
                            ).astype(jnp.float32)
                mask_col = (lax.broadcasted_iota(jnp.int32, (TM, 1), 0) < nb_i
                            ).astype(jnp.float32)
                tile_sum = jnp.dot(mask_row, y,
                                   preferred_element_type=jnp.float32)
                tile_mean = tile_sum / nb_safe
                yc = (y - tile_mean) * mask_col
                tile_m2 = jnp.dot(mask_row, yc * yc,
                                  preferred_element_type=jnp.float32)
                merge(tile_mean, tile_m2, nb_f)

    return kernel


def _bn_apply_kernel(y_ref, scale_ref, shift_ref, o_ref):
    """Pass 2: y * scale + shift with pre-folded global batch statistics."""
    o_ref[...] = (y_ref[...].astype(jnp.float32) * scale_ref[...]
                  + shift_ref[...]).astype(o_ref.dtype)


def conv_bn_2d(x_nchw, weight_oihw, gamma, beta, *, padding=0, dilation=1,
               eps=1e-5, block_m=1024, block_m2=2048,
               matmul_dtype=jnp.bfloat16, num_core_splits=2):
    """Forward of ConvBn2d. x_nchw: (N, Cin, H, W) f32 -> (N, Cout, Ho, Wo) f32.

    Stride is fixed at 1 (the PyTorch module never sets it)."""
    N, Cin, H, W = x_nchw.shape
    Cout, Cin_w, KH, KW = weight_oihw.shape
    assert Cin_w == Cin

    Ho = H + 2 * padding - dilation * (KH - 1)
    Wo = W + 2 * padding - dilation * (KW - 1)
    M = N * Ho * Wo
    K = KH * KW * Cin

    in_bytes = jnp.dtype(matmul_dtype).itemsize
    inter_dtype = jnp.bfloat16 if in_bytes == 2 else jnp.float32
    y_bytes = jnp.dtype(inter_dtype).itemsize

    # Lane/sublane/packing-dense padded sizes.
    Cp = _round_up(Cout, 128)                       # lane-dense output channels
    kpack = {4: 8, 2: 16, 1: 32}[in_bytes]          # sublane packing of dtype
    Kp = _round_up(K, kpack)                        # contraction dim

    # ---- pass-1 row tile: as big as a ~20 MiB double-buffered set allows ----
    vmem_budget = 20 * 1024 * 1024
    TM = min(_round_up(block_m, 8), _round_up(M, 8))

    def _p1_step_bytes(t):
        return 2 * t * (Kp * in_bytes + Cp * y_bytes) + 2 * Kp * Cp * in_bytes

    while TM > 256 and _p1_step_bytes(TM) > vmem_budget:
        TM = _round_up(TM // 2, 8)

    n_tiles = _cdiv(M, TM)
    NC = num_core_splits if n_tiles >= num_core_splits else 1
    n_per_core = _cdiv(n_tiles, NC)
    rows_per_core = n_per_core * TM
    Mp = NC * rows_per_core
    has_partial = (Mp != M)

    # ---- pass-2 row tile: streaming normalize; bigger tile, must divide Mp --
    TM2 = TM
    while (TM2 * 2 <= _round_up(block_m2, 8) and Mp % (TM2 * 2) == 0
           and 2 * (TM2 * 2) * Cp * (y_bytes + 4) <= vmem_budget):
        TM2 *= 2
    n2 = Mp // TM2

    # ---- wrapper glue: layout, zero-pad, im2col repack (plain JAX) ----
    x_nhwc = jnp.transpose(x_nchw, (0, 2, 3, 1))
    x_pad = jnp.pad(x_nhwc,
                    ((0, 0), (padding, padding), (padding, padding), (0, 0)))
    x_pad = x_pad.astype(matmul_dtype)

    # im2col: stack the KH*KW shifted windows along the channel axis so the
    # conv is a single (M, K) @ (K, Cout) contraction per row tile.
    wins = [x_pad[:, kh * dilation:kh * dilation + Ho,
                  kw * dilation:kw * dilation + Wo, :]
            for kh in range(KH) for kw in range(KW)]
    patches = jnp.concatenate(wins, axis=-1).reshape(M, K)
    patches = jnp.pad(patches, ((0, Mp - M), (0, Kp - K)))

    # (Cout, Cin, KH, KW) -> (KH*KW*Cin, Cout) -> padded (Kp, Cp)
    w2 = jnp.transpose(weight_oihw, (2, 3, 1, 0)).reshape(K, Cout)
    w2 = jnp.pad(w2.astype(matmul_dtype), ((0, Kp - K), (0, Cp - Cout)))

    gamma_p = jnp.pad(gamma.reshape(1, Cout).astype(jnp.float32),
                      ((0, 0), (0, Cp - Cout)))
    beta_p = jnp.pad(beta.reshape(1, Cout).astype(jnp.float32),
                     ((0, 0), (0, Cp - Cout)))

    vmem_limit = 32 * 1024 * 1024              # explicit; safe for v7x's 64 MiB
    cp_stats = pltpu.CompilerParams(
        dimension_semantics=("parallel", "arbitrary"),   # per-core partials /
        vmem_limit_bytes=vmem_limit)                     # Chan merge over tiles
    cp_apply = pltpu.CompilerParams(
        dimension_semantics=("parallel",),
        vmem_limit_bytes=vmem_limit)

    # ---- pass 1: conv + per-core batch-statistic partials ----
    conv_out, mean_o, m2_o = pl.pallas_call(
        _make_conv_stats_kernel(TM, M, rows_per_core, has_partial),
        out_shape=(jax.ShapeDtypeStruct((Mp, Cp), inter_dtype),
                   jax.ShapeDtypeStruct((NC * 8, Cp), jnp.float32),
                   jax.ShapeDtypeStruct((NC * 8, Cp), jnp.float32)),
        grid=(NC, n_per_core),
        in_specs=[pl.BlockSpec((TM, Kp), lambda c, i: (c * n_per_core + i, 0)),
                  pl.BlockSpec((Kp, Cp), lambda c, i: (0, 0))],
        out_specs=(pl.BlockSpec((TM, Cp), lambda c, i: (c * n_per_core + i, 0)),
                   pl.BlockSpec((8, Cp), lambda c, i: (c, 0)),
                   pl.BlockSpec((8, Cp), lambda c, i: (c, 0))),
        compiler_params=cp_stats,
    )(patches, w2)

    # ---- merge the per-core partials; fold BN into scale/shift (tiny) ----
    mean_c = mean_o.reshape(NC, 8, Cp)[:, 0, :]                    # (NC, Cp)
    m2_c = m2_o.reshape(NC, 8, Cp)[:, 0, :]
    counts = jnp.clip(
        float(M) - jnp.arange(NC, dtype=jnp.float32) * float(rows_per_core),
        0.0, float(rows_per_core)).reshape(NC, 1)
    mean = jnp.sum(counts * mean_c, axis=0, keepdims=True) / M     # (1, Cp)
    var = jnp.sum(m2_c + counts * (mean_c - mean) ** 2,
                  axis=0, keepdims=True) / M                       # biased
    scale = gamma_p * lax.rsqrt(var + eps)
    shift = beta_p - mean * scale

    # ---- pass 2: normalize with the folded global statistics ----
    out2d = pl.pallas_call(
        _bn_apply_kernel,
        out_shape=jax.ShapeDtypeStruct((Mp, Cp), jnp.float32),
        grid=(n2,),
        in_specs=[pl.BlockSpec((TM2, Cp), lambda i: (i, 0)),
                  pl.BlockSpec((1, Cp), lambda i: (0, 0)),
                  pl.BlockSpec((1, Cp), lambda i: (0, 0))],
        out_specs=pl.BlockSpec((TM2, Cp), lambda i: (i, 0)),
        compiler_params=cp_apply,
    )(conv_out, scale, shift)

    out = out2d[:M, :Cout].reshape(N, Ho, Wo, Cout)
    return jnp.transpose(out, (0, 3, 1, 2))    # back to NCHW


def _reference(x_nchw, weight_oihw, gamma, beta, *, padding, dilation, eps=1e-5):
    """Pure-JAX f32 reference of Conv2d(bias=False) + BatchNorm2d (training)."""
    y = lax.conv_general_dilated(
        x_nchw, weight_oihw,
        window_strides=(1, 1),
        padding=[(padding, padding), (padding, padding)],
        rhs_dilation=(dilation, dilation),
        dimension_numbers=("NCHW", "OIHW", "NCHW"))
    mean = jnp.mean(y, axis=(0, 2, 3), keepdims=True)
    var = jnp.mean((y - mean) ** 2, axis=(0, 2, 3), keepdims=True)  # biased
    g = gamma.reshape(1, -1, 1, 1)
    b = beta.reshape(1, -1, 1, 1)
    return (y - mean) * lax.rsqrt(var + eps) * g + b


if __name__ == "__main__":
    # ConvBn2d(in_channel=4, out_channel=8, kernel_size=3, padding=1,
    # dilation=1) on a (2, 4, 16, 16) NCHW input.
    N, Cin, H, W = 2, 4, 16, 16
    Cout, Ksz, PAD, DIL = 8, 3, 1, 1

    key = jax.random.PRNGKey(0)
    kx, kw, kg, kb = jax.random.split(key, 4)
    x = jax.random.normal(kx, (N, Cin, H, W), dtype=jnp.float32)
    weight = jax.random.normal(kw, (Cout, Cin, Ksz, Ksz), dtype=jnp.float32) * 0.1
    gamma = 1.0 + 0.1 * jax.random.normal(kg, (Cout,), dtype=jnp.float32)
    beta = 0.1 * jax.random.normal(kb, (Cout,), dtype=jnp.float32)

    ref = _reference(x, weight, gamma, beta, padding=PAD, dilation=DIL)

    # f32-operand path: tight check.
    out_f32 = conv_bn_2d(x, weight, gamma, beta, padding=PAD, dilation=DIL,
                         matmul_dtype=jnp.float32)
    out_f32 = jax.block_until_ready(out_f32)
    np.testing.assert_allclose(np.asarray(out_f32), np.asarray(ref),
                               rtol=2e-3, atol=2e-3)

    # default bf16-operand / bf16-intermediate path (v6e/v7x MXU): looser check.
    out_bf16 = conv_bn_2d(x, weight, gamma, beta, padding=PAD, dilation=DIL)
    out_bf16 = jax.block_until_ready(out_bf16)
    np.testing.assert_allclose(np.asarray(out_bf16), np.asarray(ref),
                               rtol=2e-2, atol=2e-2)

    # Small-tile config exercising the multi-core stats split (NC=2), the
    # Chan per-core merge, and the partial/empty-tile masked path.
    out_split = conv_bn_2d(x, weight, gamma, beta, padding=PAD, dilation=DIL,
                           matmul_dtype=jnp.float32, block_m=120,
                           block_m2=256, num_core_splits=2)
    out_split = jax.block_until_ready(out_split)
    np.testing.assert_allclose(np.asarray(out_split), np.asarray(ref),
                               rtol=2e-3, atol=2e-3)

    print("KERNEL_OK")
</pallas_src>

<mosaic_0001>
module attributes {stable_mosaic.version = 11 : i64} {
  func.func @kernel(%arg0: i32, %arg1: i32, %arg2: memref<512x40xf32, #tpu.memory_space<vmem>>, %arg3: memref<40x128xf32, #tpu.memory_space<vmem>>, %arg4: memref<512x128xf32, #tpu.memory_space<vmem>>, %arg5: memref<8x128xf32, #tpu.memory_space<vmem>>, %arg6: memref<8x128xf32, #tpu.memory_space<vmem>>) attributes {dimension_semantics = [#tpu.dimension_semantics<parallel>, #tpu.dimension_semantics<arbitrary>], iteration_bounds = array<i64: 1, 1>, scalar_prefetch = 0 : i64, scratch_operands = 0 : i64, tpu.core_type = #tpu.core_type<tc>, window_params = [{transform_indices = @transform_0, window_bounds = array<i64: 512, 40>}, {pipeline_mode = #tpu.pipeline_mode<synchronous>, transform_indices = @transform_1, window_bounds = array<i64: 40, 128>}, {transform_indices = @transform_2, window_bounds = array<i64: 512, 128>}, {transform_indices = @transform_3, window_bounds = array<i64: 8, 128>}, {transform_indices = @transform_4, window_bounds = array<i64: 8, 128>}]} {
    %c0 = arith.constant 0 : index
    %c0_0 = arith.constant 0 : index
    %0 = vector.load %arg2[%c0, %c0_0] : memref<512x40xf32, #tpu.memory_space<vmem>>, vector<512x40xf32>
    %c0_1 = arith.constant 0 : index
    %c0_2 = arith.constant 0 : index
    %1 = vector.load %arg3[%c0_1, %c0_2] : memref<40x128xf32, #tpu.memory_space<vmem>>, vector<40x128xf32>
    %cst = arith.constant dense<0.000000e+00> : vector<512x128xf32>
    %2 = tpu.matmul %0, %1, %cst {dimension_numbers = #tpu.dot_dimension_numbers<[1], [0], [0], [1], [0, 0, 1, 1], [], []>} : vector<512x40xf32>, vector<40x128xf32>, vector<512x128xf32> -> vector<512x128xf32>
    %c0_3 = arith.constant 0 : index
    %c0_4 = arith.constant 0 : index
    %3 = vector.load %arg4[%c0_3, %c0_4] : memref<512x128xf32, #tpu.memory_space<vmem>>, vector<512x128xf32>
    tpu.vector_store %arg4[%c0_3, %c0_4], %2 {strides = array<i32>} : memref<512x128xf32, #tpu.memory_space<vmem>>, vector<512x128xf32>,
    %c0_i32 = arith.constant 0 : i32
    %4 = arith.cmpi eq, %arg1, %c0_i32 : i32
    %5 = arith.extui %4 : i1 to i32
    %c0_i32_5 = arith.constant 0 : i32
    %6 = arith.cmpi ne, %5, %c0_i32_5 : i32
    scf.if %6 {
      %cst_27 = arith.constant 0.000000e+00 : f32
      %42 = vector.broadcast %cst_27 : f32 to vector<8x128xf32>
      %c0_28 = arith.constant 0 : index
      %c0_29 = arith.constant 0 : index
      %43 = vector.load %arg5[%c0_28, %c0_29] : memref<8x128xf32, #tpu.memory_space<vmem>>, vector<8x128xf32>
      tpu.vector_store %arg5[%c0_28, %c0_29], %42 {strides = array<i32>} : memref<8x128xf32, #tpu.memory_space<vmem>>, vector<8x128xf32>,
      %cst_30 = arith.constant 0.000000e+00 : f32
      %44 = vector.broadcast %cst_30 : f32 to vector<8x128xf32>
      %c0_31 = arith.constant 0 : index
      %c0_32 = arith.constant 0 : index
      %45 = vector.load %arg6[%c0_31, %c0_32] : memref<8x128xf32, #tpu.memory_space<vmem>>, vector<8x128xf32>
      tpu.vector_store %arg6[%c0_31, %c0_32], %44 {strides = array<i32>} : memref<8x128xf32, #tpu.memory_space<vmem>>, vector<8x128xf32>,
    } else {
    }
    %c512_i32 = arith.constant 512 : i32
    %7 = arith.muli %arg0, %c512_i32 : i32
    %c512_i32_6 = arith.constant 512 : i32
    %8 = arith.subi %c512_i32_6, %7 : i32
    %c512_i32_7 = arith.constant 512 : i32
    %9 = arith.muli %arg1, %c512_i32_7 : i32
    %c0_i32_8 = arith.constant 0 : i32
    %10 = arith.maxsi %c0_i32_8, %8 : i32
    %11 = arith.minsi %9, %10 : i32
    %cst_9 = arith.constant 1.000000e+00 : f32
    %12 = vector.broadcast %cst_9 : f32 to vector<1x512xf32>
    %cst_10 = arith.constant dense<0.000000e+00> : vector<1x128xf32>
    %13 = tpu.matmul %12, %2, %cst_10 {dimension_numbers = #tpu.dot_dimension_numbers<[1], [0], [0], [1], [0, 0, 1, 1], [], []>} : vector<1x512xf32>, vector<512x128xf32>, vector<1x128xf32> -> vector<1x128xf32>
    %cst_11 = arith.constant 0.001953125 : f32
    %14 = vector.broadcast %cst_11 : f32 to vector<1x128xf32>
    %15 = arith.mulf %13, %14 : vector<1x128xf32>
    %16 = vector.broadcast %15 : vector<1x128xf32> to vector<512x128xf32>
    %17 = arith.subf %2, %16 : vector<512x128xf32>
    %18 = arith.mulf %17, %17 : vector<512x128xf32>
    %cst_12 = arith.constant dense<0.000000e+00> : vector<1x128xf32>
    %19 = tpu.matmul %12, %18, %cst_12 {dimension_numbers = #tpu.dot_dimension_numbers<[1], [0], [0], [1], [0, 0, 1, 1], [], []>} : vector<1x512xf32>, vector<512x128xf32>, vector<1x128xf32> -> vector<1x128xf32>
    %20 = arith.sitofp %11 : i32 to f32
    %cst_13 = arith.constant 5.120000e+02 : f32
    %21 = arith.addf %20, %cst_13 : f32
    %cst_14 = arith.constant 1.000000e+00 : f32
    %22 = arith.maximumf %21, %cst_14 : f32
    %c0_15 = arith.constant 0 : index
    %c0_16 = arith.constant 0 : index
    %23 = vector.load %arg5[%c0_15, %c0_16] : memref<8x128xf32, #tpu.memory_space<vmem>>, vector<8x128xf32>
    %24 = vector.broadcast %15 : vector<1x128xf32> to vector<8x128xf32>
    %25 = arith.subf %24, %23 : vector<8x128xf32>
    %c0_17 = arith.constant 0 : index
    %c0_18 = arith.constant 0 : index
    %26 = vector.load %arg5[%c0_17, %c0_18] : memref<8x128xf32, #tpu.memory_space<vmem>>, vector<8x128xf32>
    %cst_19 = arith.constant 5.120000e+02 : f32
    %27 = arith.divf %cst_19, %22 : f32
    %28 = vector.broadcast %27 : f32 to vector<8x128xf32>
    %29 = arith.mulf %25, %28 : vector<8x128xf32>
    %30 = arith.addf %26, %29 : vector<8x128xf32>
    %c0_20 = arith.constant 0 : index
    %c0_21 = arith.constant 0 : index
    %31 = vector.load %arg5[%c0_20, %c0_21] : memref<8x128xf32, #tpu.memory_space<vmem>>, vector<8x128xf32>
    tpu.vector_store %arg5[%c0_20, %c0_21], %30 {strides = array<i32>} : memref<8x128xf32, #tpu.memory_space<vmem>>, vector<8x128xf32>,
    %c0_22 = arith.constant 0 : index
    %c0_23 = arith.constant 0 : index
    %32 = vector.load %arg6[%c0_22, %c0_23] : memref<8x128xf32, #tpu.memory_space<vmem>>, vector<8x128xf32>
    %33 = vector.broadcast %19 : vector<1x128xf32> to vector<8x128xf32>
    %34 = arith.addf %32, %33 : vector<8x128xf32>
    %35 = arith.mulf %25, %25 : vector<8x128xf32>
    %cst_24 = arith.constant 5.120000e+02 : f32
    %36 = arith.mulf %20, %cst_24 : f32
    %37 = arith.divf %36, %22 : f32
    %38 = vector.broadcast %37 : f32 to vector<8x128xf32>
    %39 = arith.mulf %35, %38 : vector<8x128xf32>
    %40 = arith.addf %34, %39 : vector<8x128xf32>
    %c0_25 = arith.constant 0 : index
    %c0_26 = arith.constant 0 : index
    %41 = vector.load %arg6[%c0_25, %c0_26] : memref<8x128xf32, #tpu.memory_space<vmem>>, vector<8x128xf32>
    tpu.vector_store %arg6[%c0_25, %c0_26], %40 {strides = array<i32>} : memref<8x128xf32, #tpu.memory_space<vmem>>, vector<8x128xf32>,
    return
  }
  func.func @transform_0(%arg0: i32, %arg1: i32) -> (i32, i32) {
    %c1_i32 = arith.constant 1 : i32
    %0 = arith.muli %arg0, %c1_i32 : i32
    %1 = arith.addi %0, %arg1 : i32
    %c0_i32 = arith.constant 0 : i32
    %c0_i32_0 = arith.constant 0 : i32
    return %1, %c0_i32 : i32, i32
  }
  func.func @transform_1(%arg0: i32, %arg1: i32) -> (i32, i32) {
    %c0_i32 = arith.constant 0 : i32
    %c0_i32_0 = arith.constant 0 : i32
    %c0_i32_1 = arith.constant 0 : i32
    return %c0_i32, %c0_i32_0 : i32, i32
  }
  func.func @transform_2(%arg0: i32, %arg1: i32) -> (i32, i32) {
    %c1_i32 = arith.constant 1 : i32
    %0 = arith.muli %arg0, %c1_i32 : i32
    %1 = arith.addi %0, %arg1 : i32
    %c0_i32 = arith.constant 0 : i32
    %c0_i32_0 = arith.constant 0 : i32
    return %1, %c0_i32 : i32, i32
  }
  func.func @transform_3(%arg0: i32, %arg1: i32) -> (i32, i32) {
    %c0_i32 = arith.constant 0 : i32
    %c0_i32_0 = arith.constant 0 : i32
    return %arg0, %c0_i32 : i32, i32
  }
  func.func @transform_4(%arg0: i32, %arg1: i32) -> (i32, i32) {
    %c0_i32 = arith.constant 0 : i32
    %c0_i32_0 = arith.constant 0 : i32
    return %arg0, %c0_i32 : i32, i32
  }
}

</mosaic_0001>

<bundles_post_ra>
// kernel: tpu_custom_call.1
= control target key start
LH: loop header
LB: loop body
LE: loop exit
PB: predicated region body
PF: predicated region fallthrough
CT: control target
= control target key end

     0   :  { %10 = vsyncpa [#allocation3], 0  ;;  %vm109_vm0 = vcmask 326656   ;;  %s2424_s0 = inlined_call_operand.vmem [shape: f32[512,40], index: 0, kind: input, shape index: {}]   ;;  %s2425_s1 = inlined_call_operand.vmem [shape: f32[40,128], index: 1, kind: input, shape index: {}]   ;;  %s2426_s2 = inlined_call_operand.hbm [shape: f32[512,128], index: 2, kind: output, shape index: {0}]   ;;  %s2427_s3 = inlined_call_operand.hbm [shape: f32[8,128], index: 3, kind: output, shape index: {1}]   ;;  %s2428_s4 = inlined_call_operand.hbm [shape: f32[8,128], index: 4, kind: output, shape index: {2}]  }
   0x1   :  { %v108_v0 = vld [vmem:[%s2425_s1 + $0x20] sm:$0xff]  ;;  %v107_v1 = vld [vmem:[%s2425_s1 + $0x18] sm:$0xff]  ;;  %v106_v3 = vld [vmem:[%s2425_s1 + $0x10] sm:$0xff] }
   0x2   :  { %1532 = vmatprep.subr.mxu0 %v108_v0  ;;  %v40_v2 = vld [vmem:[%s2424_s0] sm:$0xff]  ;;  %v105_v4 = vld [vmem:[%s2425_s1 + $0x8] sm:$0xff]  ;;  %v42_v7 = vld [vmem:[%s2424_s0 + $0x10] sm:$0xff] }
   0x3   :  { %1533 = vmatpush3.msra.mxu0 %v108_v0  ;;  %1542 = vmatprep.mubr.msk.f32.mxu0 %vm109_vm0, %v40_v2  ;;  %v104_v5 = vld [vmem:[%s2425_s1] sm:$0xff]  ;;  %v41_v6 = vld [vmem:[%s2424_s0 + $0x8] sm:$0xff]  ;;  %v43_v8 = vld [vmem:[%s2424_s0 + $0x18] sm:$0xff] }
   0x4   :  { %1534 = vmatprep.subr.mxu0 %v107_v1  ;;  %v44_v9 = vld [vmem:[%s2424_s0 + $0x20] sm:$0xff]  ;;  %v45_v10 = vld [vmem:[%s2424_s0 + $0x28] sm:$0xff]  ;;  %v46_v11 = vld [vmem:[%s2424_s0 + $0x30] sm:$0xff] }
   0x5   :  { %1535 = vmatpush3.msra.mxu0 %v107_v1  ;;  %v47_v12 = vld [vmem:[%s2424_s0 + $0x38] sm:$0xff]  ;;  %v48_v13 = vld [vmem:[%s2424_s0 + $0x40] sm:$0xff] }
   0x6   :  { %1536 = vmatprep.subr.mxu0 %v106_v3 }
   0x7   :  { %1537 = vmatpush3.msra.mxu0 %v106_v3 }
   0x8   :  { %1538 = vmatprep.subr.mxu0 %v105_v4 }
   0x9   :  { %1539 = vmatpush3.msra.mxu0 %v105_v4 }
   0xa   :  { %1540 = vmatprep.subr.mxu0 %v104_v5 }
   0xb   :  { %1541 = vmatpush3.msra.mxu0 %v104_v5 }
   0xc   :  { %1543 = vmatmul.mubr.msk.f32.vlgmr.msra.gmra.mxu0 %vm109_vm0, %v41_v6 }
   0xd   :  { %1545 = vmatprep.mubr.msk.f32.mxu0 %vm109_vm0, %v42_v7 }
  0x10   :  { %1546 = vmatmul.mubr.msk.f32.gmra.mxu0 %vm109_vm0, %v43_v8 }
  0x11   :  { %1548 = vmatprep.mubr.msk.f32.mxu0 %vm109_vm0, %v44_v9 }
  0x14   :  { %1549 = vmatmul.mubr.msk.f32.gmra.mxu0 %vm109_vm0, %v45_v10 }
  0x15   :  { %1551 = vmatprep.mubr.msk.f32.mxu0 %vm109_vm0, %v46_v11 }
  0x18   :  { %1552 = vmatmul.mubr.msk.f32.gmra.mxu0 %vm109_vm0, %v47_v12 }
  0x19   :  { %11 = vsyncpa [#allocation5], 0  ;;  %1554 = vmatprep.mubr.msk.f32.mxu0 %vm109_vm0, %v48_v13  ;;  %v49_v14 = vld [vmem:[%s2424_s0 + $0x48] sm:$0xff]  ;;  %v50_v15 = vld [vmem:[%s2424_s0 + $0x50] sm:$0xff]  ;;  %v2429_v5 = vmov 1.0   ;;  %s1711_s19 = smov [#allocation2]  }
  0x1a   :  { %v51_v16 = vld [vmem:[%s2424_s0 + $0x58] sm:$0xff]  ;;  %v52_v17 = vld [vmem:[%s2424_s0 + $0x60] sm:$0xff]  ;;  %v53_v18 = vld [vmem:[%s2424_s0 + $0x68] sm:$0xff]  ;;  %828 = vmatprep.mubr.f32.mxu1 %v2429_v5  ;;  %s1215_s20 = sshll.u32 %s1711_s19, 4  ;;  %s1216_s20 = int_to_ptr.vmem [resolvable:$true] %s1215_s20 }
  0x1b   :  { %v54_v19 = vld [vmem:[%s2424_s0 + $0x70] sm:$0xff]  ;;  %v55_v20 = vld [vmem:[%s2424_s0 + $0x78] sm:$0xff]  ;;  %v56_v21 = vld [vmem:[%s2424_s0 + $0x80] sm:$0xff] }
  0x1c   :  { %1555 = vmatmul.mubr.msk.f32.gmra.mxu0 %vm109_vm0, %v49_v14  ;;  %v57_v22 = vld [vmem:[%s2424_s0 + $0x88] sm:$0xff]  ;;  %v58_v23 = vld [vmem:[%s2424_s0 + $0x90] sm:$0xff]  ;;  %v59_v24 = vld [vmem:[%s2424_s0 + $0x98] sm:$0xff] }
  0x1d   :  { %1557 = vmatprep.mubr.msk.f32.mxu0 %vm109_vm0, %v50_v15  ;;  %v60_v25 = vld [vmem:[%s2424_s0 + $0xa0] sm:$0xff]  ;;  %v61_v26 = vld [vmem:[%s2424_s0 + $0xa8] sm:$0xff]  ;;  %v62_v27 = vld [vmem:[%s2424_s0 + $0xb0] sm:$0xff] }
  0x1e   :  { %v63_v28 = vld [vmem:[%s2424_s0 + $0xb8] sm:$0xff]  ;;  %v64_v29 = vld [vmem:[%s2424_s0 + $0xc0] sm:$0xff]  ;;  %v65_v30 = vld [vmem:[%s2424_s0 + $0xc8] sm:$0xff] }
  0x1f   :  { %v66_v31 = vld [vmem:[%s2424_s0 + $0xd0] sm:$0xff]  ;;  %v67_v32 = vld [vmem:[%s2424_s0 + $0xd8] sm:$0xff]  ;;  %v68_v33 = vld [vmem:[%s2424_s0 + $0xe0] sm:$0xff] }
  0x20   :  { %1558 = vmatmul.mubr.msk.f32.gmra.mxu0 %vm109_vm0, %v51_v16  ;;  %v69_v34 = vld [vmem:[%s2424_s0 + $0xe8] sm:$0xff]  ;;  %v70_v35 = vld [vmem:[%s2424_s0 + $0xf0] sm:$0xff]  ;;  %v71_v36 = vld [vmem:[%s2424_s0 + $0xf8] sm:$0xff] }
  0x21   :  { %1560 = vmatprep.mubr.msk.f32.mxu0 %vm109_vm0, %v52_v17  ;;  %v72_v37 = vld [vmem:[%s2424_s0 + $0x100] sm:$0xff]  ;;  %v73_v38 = vld [vmem:[%s2424_s0 + $0x108] sm:$0xff]  ;;  %v74_v39 = vld [vmem:[%s2424_s0 + $0x110] sm:$0xff] }
  0x22   :  { %v75_v40 = vld [vmem:[%s2424_s0 + $0x118] sm:$0xff]  ;;  %v76_v41 = vld [vmem:[%s2424_s0 + $0x120] sm:$0xff]  ;;  %v77_v42 = vld [vmem:[%s2424_s0 + $0x128] sm:$0xff] }
  0x23   :  { %v78_v43 = vld [vmem:[%s2424_s0 + $0x130] sm:$0xff]  ;;  %v79_v44 = vld [vmem:[%s2424_s0 + $0x138] sm:$0xff]  ;;  %v80_v45 = vld [vmem:[%s2424_s0 + $0x140] sm:$0xff] }
  0x24   :  { %1561 = vmatmul.mubr.msk.f32.gmra.mxu0 %vm109_vm0, %v53_v18  ;;  %v81_v46 = vld [vmem:[%s2424_s0 + $0x148] sm:$0xff]  ;;  %v82_v47 = vld [vmem:[%s2424_s0 + $0x150] sm:$0xff]  ;;  %v83_v48 = vld [vmem:[%s2424_s0 + $0x158] sm:$0xff] }
  0x25   :  { %1563 = vmatprep.mubr.msk.f32.mxu0 %vm109_vm0, %v54_v19  ;;  %v84_v49 = vld [vmem:[%s2424_s0 + $0x160] sm:$0xff]  ;;  %v85_v50 = vld [vmem:[%s2424_s0 + $0x168] sm:$0xff]  ;;  %v86_v51 = vld [vmem:[%s2424_s0 + $0x170] sm:$0xff] }
  0x26   :  { %v87_v52 = vld [vmem:[%s2424_s0 + $0x178] sm:$0xff]  ;;  %v88_v53 = vld [vmem:[%s2424_s0 + $0x180] sm:$0xff]  ;;  %v89_v54 = vld [vmem:[%s2424_s0 + $0x188] sm:$0xff] }
  0x27   :  { %v90_v55 = vld [vmem:[%s2424_s0 + $0x190] sm:$0xff]  ;;  %v91_v56 = vld [vmem:[%s2424_s0 + $0x198] sm:$0xff]  ;;  %v92_v57 = vld [vmem:[%s2424_s0 + $0x1a0] sm:$0xff] }
  0x28   :  { %1564 = vmatmul.mubr.msk.f32.gmra.mxu0 %vm109_vm0, %v55_v20  ;;  %v93_v58 = vld [vmem:[%s2424_s0 + $0x1a8] sm:$0xff]  ;;  %v94_v59 = vld [vmem:[%s2424_s0 + $0x1b0] sm:$0xff]  ;;  %v95_v60 = vld [vmem:[%s2424_s0 + $0x1b8] sm:$0xff] }
  0x29   :  { %1566 = vmatprep.mubr.msk.f32.mxu0 %vm109_vm0, %v56_v21  ;;  %v96_v61 = vld [vmem:[%s2424_s0 + $0x1c0] sm:$0xff]  ;;  %v97_v62 = vld [vmem:[%s2424_s0 + $0x1c8] sm:$0xff]  ;;  %v98_v63 = vld [vmem:[%s2424_s0 + $0x1d0] sm:$0xff] }
  0x2a   :  { %v99_v0 = vld [vmem:[%s2424_s0 + $0x1d8] sm:$0xff]  ;;  %v100_v1 = vld [vmem:[%s2424_s0 + $0x1e0] sm:$0xff]  ;;  %v101_v2 = vld [vmem:[%s2424_s0 + $0x1e8] sm:$0xff] }
  0x2b   :  { %v102_v3 = vld [vmem:[%s2424_s0 + $0x1f0] sm:$0xff]  ;;  %v103_v4 = vld [vmem:[%s2424_s0 + $0x1f8] sm:$0xff]  ;;  %s1710_s0 = smov [#allocation4]  }
  0x2c   :  { %1567 = vmatmul.mubr.msk.f32.gmra.mxu0 %vm109_vm0, %v57_v22  ;;  %s1228_s18 = sshll.u32 %s1710_s0, 4  ;;  %s1229_s18 = int_to_ptr.vmem [resolvable:$true] %s1228_s18 }
  0x2d   :  { %1569 = vmatprep.mubr.msk.f32.mxu0 %vm109_vm0, %v58_v23  ;;  %s1645_s21 = scalar_lea.vmem %s1229_s18, 128  ;;  %p1650_p1 = scmp.lt.s32.totalorder %s1229_s18, %s1229_s18 }
  0x2e   :  { %p1646_p0 = scmp.ne.s32.totalorder %s1229_s18, %s1645_s21  ;;  %p1651_p2 = scmp.lt.s32.totalorder %s1645_s21, %s1645_s21 }
  0x30   :  { %1570 = vmatmul.mubr.msk.f32.gmra.mxu0 %vm109_vm0, %v59_v24  ;;  %p1652_p3 = por %p1651_p2, %p1650_p1 }
  0x31   :  { %1572 = vmatprep.mubr.msk.f32.mxu0 %vm109_vm0, %v60_v25 }
  0x32   :  { %p1653_p4 = pnand %p1652_p3, %p1646_p0 }
  0x34   :  { %1573 = vmatmul.mubr.msk.f32.gmra.mxu0 %vm109_vm0, %v61_v26 }
  0x35   :  { %1575 = vmatprep.mubr.msk.f32.mxu0 %vm109_vm0, %v62_v27 }
  0x38   :  { %1576 = vmatmul.mubr.msk.f32.gmra.mxu0 %vm109_vm0, %v63_v28 }
  0x39   :  { %1578 = vmatprep.mubr.msk.f32.mxu0 %vm109_vm0, %v64_v29 }
  0x3c   :  { %1579 = vmatmul.mubr.msk.f32.gmra.mxu0 %vm109_vm0, %v65_v30 }
  0x3d   :  { %1581 = vmatprep.mubr.msk.f32.mxu0 %vm109_vm0, %v66_v31 }
  0x40   :  { %1582 = vmatmul.mubr.msk.f32.gmra.mxu0 %vm109_vm0, %v67_v32 }
  0x41   :  { %1584 = vmatprep.mubr.msk.f32.mxu0 %vm109_vm0, %v68_v33 }
  0x44   :  { %1585 = vmatmul.mubr.msk.f32.gmra.mxu0 %vm109_vm0, %v69_v34 }
  0x45   :  { %1587 = vmatprep.mubr.msk.f32.mxu0 %vm109_vm0, %v70_v35 }
  0x48   :  { %1588 = vmatmul.mubr.msk.f32.gmra.mxu0 %vm109_vm0, %v71_v36 }
  0x49   :  { %1590 = vmatprep.mubr.msk.f32.mxu0 %vm109_vm0, %v72_v37 }
  0x4c   :  { %1591 = vmatmul.mubr.msk.f32.gmra.mxu0 %vm109_vm0, %v73_v38 }
  0x4d   :  { %1593 = vmatprep.mubr.msk.f32.mxu0 %vm109_vm0, %v74_v39 }
  0x50   :  { %1594 = vmatmul.mubr.msk.f32.gmra.mxu0 %vm109_vm0, %v75_v40 }
  0x51   :  { %1596 = vmatprep.mubr.msk.f32.mxu0 %vm109_vm0, %v76_v41 }
  0x54   :  { %1597 = vmatmul.mubr.msk.f32.gmra.mxu0 %vm109_vm0, %v77_v42 }
  0x55   :  { %1599 = vmatprep.mubr.msk.f32.mxu0 %vm109_vm0, %v78_v43 }
  0x58   :  { %1600 = vmatmul.mubr.msk.f32.gmra.mxu0 %vm109_vm0, %v79_v44 }
  0x59   :  { %1602 = vmatprep.mubr.msk.f32.mxu0 %vm109_vm0, %v80_v45 }
  0x5c   :  { %1603 = vmatmul.mubr.msk.f32.gmra.mxu0 %vm109_vm0, %v81_v46 }
  0x5d   :  { %1605 = vmatprep.mubr.msk.f32.mxu0 %vm109_vm0, %v82_v47 }
  0x60   :  { %1606 = vmatmul.mubr.msk.f32.gmra.mxu0 %vm109_vm0, %v83_v48 }
  0x61   :  { %1608 = vmatprep.mubr.msk.f32.mxu0 %vm109_vm0, %v84_v49 }
  0x64   :  { %1609 = vmatmul.mubr.msk.f32.gmra.mxu0 %vm109_vm0, %v85_v50 }
  0x65   :  { %1611 = vmatprep.mubr.msk.f32.mxu0 %vm109_vm0, %v86_v51 }
  0x68   :  { %1612 = vmatmul.mubr.msk.f32.gmra.mxu0 %vm109_vm0, %v87_v52 }
  0x69   :  { %1614 = vmatprep.mubr.msk.f32.mxu0 %vm109_vm0, %v88_v53 }
  0x6c   :  { %1615 = vmatmul.mubr.msk.f32.gmra.mxu0 %vm109_vm0, %v89_v54 }
  0x6d   :  { %1617 = vmatprep.mubr.msk.f32.mxu0 %vm109_vm0, %v90_v55 }
  0x70   :  { %1618 = vmatmul.mubr.msk.f32.gmra.mxu0 %vm109_vm0, %v91_v56 }
  0x71   :  { %1620 = vmatprep.mubr.msk.f32.mxu0 %vm109_vm0, %v92_v57 }
  0x74   :  { %1621 = vmatmul.mubr.msk.f32.gmra.mxu0 %vm109_vm0, %v93_v58 }
  0x75   :  { %1623 = vmatprep.mubr.msk.f32.mxu0 %vm109_vm0, %v94_v59 }
  0x78   :  { %1624 = vmatmul.mubr.msk.f32.gmra.mxu0 %vm109_vm0, %v95_v60 }
  0x79   :  { %1626 = vmatprep.mubr.msk.f32.mxu0 %vm109_vm0, %v96_v61 }
  0x7c   :  { %1627 = vmatmul.mubr.msk.f32.gmra.mxu0 %vm109_vm0, %v97_v62 }
  0x7d   :  { %1629 = vmatprep.mubr.msk.f32.mxu0 %vm109_vm0, %v98_v63 }
  0x80   :  { %1630 = vmatmul.mubr.msk.f32.gmra.mxu0 %vm109_vm0, %v99_v0 }
  0x81   :  { %1632 = vmatprep.mubr.msk.f32.mxu0 %vm109_vm0, %v100_v1 }
  0x84   :  { %1633 = vmatmul.mubr.msk.f32.gmra.mxu0 %vm109_vm0, %v101_v2 }
  0x85   :  { %1635 = vmatprep.mubr.msk.f32.mxu0 %vm109_vm0, %v102_v3 }
  0x88   :  { %1636 = vmatmul.mubr.msk.f32.gmra.mxu0 %vm109_vm0, %v103_v4 }
  0xcc   :  { %v2012_v6 = vpop.f32.mrf.mxu0 }
  0xcd   :  { %688 = vst [vmem:[#allocation2 + $0x8] sm:$0xff] %v2012_v6 }
  0xce   :  { %v2015_v7 = vpop.f32.mrf.mxu0 }
  0xcf   :  { %687 = vst [vmem:[#allocation2] sm:$0xff] %v2015_v7 }
  0xd0   :  { %v2018_v8 = vpop.f32.mrf.mxu0 }
  0xd1   :  { %690 = vst [vmem:[#allocation2 + $0x18] sm:$0xff] %v2018_v8 }
  0xd2   :  { %v2021_v9 = vpop.f32.mrf.mxu0 }
  0xd3   :  { %689 = vst [vmem:[#allocation2 + $0x10] sm:$0xff] %v2021_v9 }
  0xd4   :  { %v2024_v10 = vpop.f32.mrf.mxu0 }
  0xd5   :  { %692 = vst [vmem:[#allocation2 + $0x28] sm:$0xff] %v2024_v10 }
  0xd6   :  { %v2027_v11 = vpop.f32.mrf.mxu0 }
  0xd7   :  { %691 = vst [vmem:[#allocation2 + $0x20] sm:$0xff] %v2027_v11 }
  0xd8   :  { %v2030_v12 = vpop.f32.mrf.mxu0 }
  0xd9   :  { %694 = vst [vmem:[#allocation2 + $0x38] sm:$0xff] %v2030_v12 }
  0xda   :  { %v2033_v13 = vpop.f32.mrf.mxu0 }
  0xdb   :  { %693 = vst [vmem:[#allocation2 + $0x30] sm:$0xff] %v2033_v13 }
  0xdc   :  { %v2036_v14 = vpop.f32.mrf.mxu0 }
  0xdd   :  { %696 = vst [vmem:[#allocation2 + $0x48] sm:$0xff] %v2036_v14 }
  0xde   :  { %v2039_v15 = vpop.f32.mrf.mxu0 }
  0xdf   :  { %695 = vst [vmem:[#allocation2 + $0x40] sm:$0xff] %v2039_v15 }
  0xe0   :  { %v2042_v16 = vpop.f32.mrf.mxu0 }
  0xe1   :  { %698 = vst [vmem:[#allocation2 + $0x58] sm:$0xff] %v2042_v16 }
  0xe2   :  { %v2045_v17 = vpop.f32.mrf.mxu0 }
  0xe3   :  { %697 = vst [vmem:[#allocation2 + $0x50] sm:$0xff] %v2045_v17 }
  0xe4   :  { %v2048_v18 = vpop.f32.mrf.mxu0 }
  0xe5   :  { %700 = vst [vmem:[#allocation2 + $0x68] sm:$0xff] %v2048_v18 }
  0xe6   :  { %v2051_v19 = vpop.f32.mrf.mxu0 }
  0xe7   :  { %699 = vst [vmem:[#allocation2 + $0x60] sm:$0xff] %v2051_v19 }
  0xe8   :  { %v2054_v20 = vpop.f32.mrf.mxu0 }
  0xe9   :  { %702 = vst [vmem:[#allocation2 + $0x78] sm:$0xff] %v2054_v20 }
  0xea   :  { %v2057_v21 = vpop.f32.mrf.mxu0 }
  0xeb   :  { %701 = vst [vmem:[#allocation2 + $0x70] sm:$0xff] %v2057_v21 }
  0xec   :  { %v2060_v22 = vpop.f32.mrf.mxu0 }
  0xed   :  { %704 = vst [vmem:[#allocation2 + $0x88] sm:$0xff] %v2060_v22 }
  0xee   :  { %v2063_v23 = vpop.f32.mrf.mxu0 }
  0xef   :  { %703 = vst [vmem:[#allocation2 + $0x80] sm:$0xff] %v2063_v23 }
  0xf0   :  { %v2066_v24 = vpop.f32.mrf.mxu0 }
  0xf1   :  { %706 = vst [vmem:[#allocation2 + $0x98] sm:$0xff] %v2066_v24 }
  0xf2   :  { %v2069_v25 = vpop.f32.mrf.mxu0 }
  0xf3   :  { %705 = vst [vmem:[#allocation2 + $0x90] sm:$0xff] %v2069_v25 }
  0xf4   :  { %v2072_v26 = vpop.f32.mrf.mxu0 }
  0xf5   :  { %708 = vst [vmem:[#allocation2 + $0xa8] sm:$0xff] %v2072_v26 }
  0xf6   :  { %v2075_v27 = vpop.f32.mrf.mxu0 }
  0xf7   :  { %707 = vst [vmem:[#allocation2 + $0xa0] sm:$0xff] %v2075_v27 }
  0xf8   :  { %v2078_v28 = vpop.f32.mrf.mxu0 }
  0xf9   :  { %710 = vst [vmem:[#allocation2 + $0xb8] sm:$0xff] %v2078_v28 }
  0xfa   :  { %v2081_v29 = vpop.f32.mrf.mxu0 }
  0xfb   :  { %709 = vst [vmem:[#allocation2 + $0xb0] sm:$0xff] %v2081_v29 }
  0xfc   :  { %v2084_v30 = vpop.f32.mrf.mxu0 }
  0xfd   :  { %712 = vst [vmem:[#allocation2 + $0xc8] sm:$0xff] %v2084_v30 }
  0xfe   :  { %v2087_v31 = vpop.f32.mrf.mxu0 }
  0xff   :  { %711 = vst [vmem:[#allocation2 + $0xc0] sm:$0xff] %v2087_v31 }
 0x100   :  { %v2090_v32 = vpop.f32.mrf.mxu0 }
 0x101   :  { %714 = vst [vmem:[#allocation2 + $0xd8] sm:$0xff] %v2090_v32 }
 0x102   :  { %v2093_v33 = vpop.f32.mrf.mxu0 }
 0x103   :  { %713 = vst [vmem:[#allocation2 + $0xd0] sm:$0xff] %v2093_v33 }
 0x104   :  { %v2096_v34 = vpop.f32.mrf.mxu0 }
 0x105   :  { %716 = vst [vmem:[#allocation2 + $0xe8] sm:$0xff] %v2096_v34 }
 0x106   :  { %v2099_v35 = vpop.f32.mrf.mxu0 }
 0x107   :  { %715 = vst [vmem:[#allocation2 + $0xe0] sm:$0xff] %v2099_v35 }
 0x108   :  { %v2102_v36 = vpop.f32.mrf.mxu0 }
 0x109   :  { %718 = vst [vmem:[#allocation2 + $0xf8] sm:$0xff] %v2102_v36  ;;  %1392 = vmatprep.subr.mxu1 %v2102_v36 }
 0x10a   :  { %v2106_v37 = vpop.f32.mrf.mxu0  ;;  %1393 = vmatpush3.msra.mxu1 %v2054_v20 }
 0x10b   :  { %717 = vst [vmem:[#allocation2 + $0xf0] sm:$0xff] %v2106_v37  ;;  %1394 = vmatprep.subr.mxu1 %v2106_v37 }
 0x10c   :  { %v2111_v38 = vpop.f32.mrf.mxu0  ;;  %1395 = vmatpush3.msra.mxu1 %v2057_v21 }
 0x10d   :  { %2447 = vst [vmem:[#allocation9_spill] sm:$0xff] %v2111_v38  ;;  %720 = vst [vmem:[#allocation2 + $0x108] sm:$0xff] %v2111_v38  ;;  %1396 = vmatprep.subr.mxu1 %v2096_v34 }
 0x10e   :  { %v2116_v39 = vpop.f32.mrf.mxu0  ;;  %1397 = vmatpush3.msra.mxu1 %v2048_v18 }
 0x10f   :  { %2448 = vst [vmem:[#allocation10_spill] sm:$0xff] %v2116_v39  ;;  %719 = vst [vmem:[#allocation2 + $0x100] sm:$0xff] %v2116_v39  ;;  %1398 = vmatprep.subr.mxu1 %v2099_v35 }
 0x110   :  { %v2121_v40 = vpop.f32.mrf.mxu0  ;;  %1399 = vmatpush3.msra.mxu1 %v2051_v19 }
 0x111   :  { %2449 = vst [vmem:[#allocation11_spill] sm:$0xff] %v2121_v40  ;;  %722 = vst [vmem:[#allocation2 + $0x118] sm:$0xff] %v2121_v40  ;;  %1400 = vmatprep.subr.mxu1 %v2090_v32 }
 0x112   :  { %v2126_v41 = vpop.f32.mrf.mxu0  ;;  %1401 = vmatpush3.msra.mxu1 %v2042_v16 }
 0x113   :  { %2450 = vst [vmem:[#allocation12_spill] sm:$0xff] %v2126_v41  ;;  %721 = vst [vmem:[#allocation2 + $0x110] sm:$0xff] %v2126_v41  ;;  %1402 = vmatprep.subr.mxu1 %v2093_v33 }
 0x114   :  { %v2131_v42 = vpop.f32.mrf.mxu0  ;;  %1403 = vmatpush3.msra.mxu1 %v2045_v17 }
 0x115   :  { %2451 = vst [vmem:[#allocation13_spill] sm:$0xff] %v2131_v42  ;;  %724 = vst [vmem:[#allocation2 + $0x128] sm:$0xff] %v2131_v42  ;;  %1404 = vmatprep.subr.mxu1 %v2084_v30 }
 0x116   :  { %v2136_v43 = vpop.f32.mrf.mxu0  ;;  %1405 = vmatpush3.msra.mxu1 %v2036_v14 }
 0x117   :  { %2452 = vst [vmem:[#allocation14_spill] sm:$0xff] %v2136_v43  ;;  %723 = vst [vmem:[#allocation2 + $0x120] sm:$0xff] %v2136_v43  ;;  %1406 = vmatprep.subr.mxu1 %v2087_v31 }
 0x118   :  { %v2141_v44 = vpop.f32.mrf.mxu0  ;;  %1407 = vmatpush3.msra.mxu1 %v2039_v15 }
 0x119   :  { %2453 = vst [vmem:[#allocation15_spill] sm:$0xff] %v2141_v44  ;;  %726 = vst [vmem:[#allocation2 + $0x138] sm:$0xff] %v2141_v44  ;;  %1408 = vmatprep.subr.mxu1 %v2078_v28 }
 0x11a   :  { %v2146_v45 = vpop.f32.mrf.mxu0  ;;  %1409 = vmatpush3.msra.mxu1 %v2030_v12 }
 0x11b   :  { %2454 = vst [vmem:[#allocation16_spill] sm:$0xff] %v2146_v45  ;;  %725 = vst [vmem:[#allocation2 + $0x130] sm:$0xff] %v2146_v45  ;;  %1410 = vmatprep.subr.mxu1 %v2081_v29 }
 0x11c   :  { %v2151_v46 = vpop.f32.mrf.mxu0  ;;  %1411 = vmatpush3.msra.mxu1 %v2033_v13 }
 0x11d   :  { %728 = vst [vmem:[#allocation2 + $0x148] sm:$0xff] %v2151_v46  ;;  %1412 = vmatprep.subr.mxu1 %v2072_v26 }
 0x11e   :  { %v2156_v47 = vpop.f32.mrf.mxu0  ;;  %1413 = vmatpush3.msra.mxu1 %v2024_v10 }
 0x11f   :  { %727 = vst [vmem:[#allocation2 + $0x140] sm:$0xff] %v2156_v47  ;;  %1414 = vmatprep.subr.mxu1 %v2075_v27 }
 0x120   :  { %v2161_v48 = vpop.f32.mrf.mxu0  ;;  %1415 = vmatpush3.msra.mxu1 %v2027_v11 }
 0x121   :  { %730 = vst [vmem:[#allocation2 + $0x158] sm:$0xff] %v2161_v48  ;;  %1416 = vmatprep.subr.mxu1 %v2066_v24 }
 0x122   :  { %v2166_v49 = vpop.f32.mrf.mxu0  ;;  %1417 = vmatpush3.msra.mxu1 %v2018_v8 }
 0x123   :  { %729 = vst [vmem:[#allocation2 + $0x150] sm:$0xff] %v2166_v49  ;;  %1418 = vmatprep.subr.mxu1 %v2069_v25 }
 0x124   :  { %v2171_v50 = vpop.f32.mrf.mxu0  ;;  %1419 = vmatpush3.msra.mxu1 %v2021_v9 }
 0x125   :  { %732 = vst [vmem:[#allocation2 + $0x168] sm:$0xff] %v2171_v50  ;;  %1420 = vmatprep.subr.mxu1 %v2060_v22 }
 0x126   :  { %v2176_v51 = vpop.f32.mrf.mxu0  ;;  %1421 = vmatpush3.msra.mxu1 %v2012_v6 }
 0x127   :  { %731 = vst [vmem:[#allocation2 + $0x160] sm:$0xff] %v2176_v51  ;;  %1422 = vmatprep.subr.mxu1 %v2063_v23 }
 0x128   :  { %v2181_v52 = vpop.f32.mrf.mxu0  ;;  %1423 = vmatpush3.msra.mxu1 %v2015_v7 }
 0x129   :  { %734 = vst [vmem:[#allocation2 + $0x178] sm:$0xff] %v2181_v52  ;;  %829 = vmatmul.mubr.f32.vlgmr.msra.gmra.mxu1 %v2429_v5 }
 0x12a   :  { %v2186_v53 = vpop.f32.mrf.mxu0  ;;  %898 = vmatprep.mubr.f32.mxu1 %v2429_v5 }
 0x12b   :  { %733 = vst [vmem:[#allocation2 + $0x170] sm:$0xff] %v2186_v53 }
 0x12c   :  { %v2190_v54 = vpop.f32.mrf.mxu0 }
 0x12d   :  { %2455 = vst [vmem:[#allocation17_spill] sm:$0xff] %v2190_v54  ;;  %736 = vst [vmem:[#allocation2 + $0x188] sm:$0xff] %v2190_v54 }
 0x12e   :  { %v2193_v55 = vpop.f32.mrf.mxu0 }
 0x12f   :  { %2456 = vst [vmem:[#allocation18_spill] sm:$0xff] %v2193_v55  ;;  %735 = vst [vmem:[#allocation2 + $0x180] sm:$0xff] %v2193_v55 }
 0x130   :  { %v2196_v56 = vpop.f32.mrf.mxu0 }
 0x131   :  { %2457 = vst [vmem:[#allocation19_spill] sm:$0xff] %v2196_v56  ;;  %738 = vst [vmem:[#allocation2 + $0x198] sm:$0xff] %v2196_v56 }
 0x132   :  { %v2199_v57 = vpop.f32.mrf.mxu0 }
 0x133   :  { %2458 = vst [vmem:[#allocation20_spill] sm:$0xff] %v2199_v57  ;;  %737 = vst [vmem:[#allocation2 + $0x190] sm:$0xff] %v2199_v57 }
 0x134   :  { %v2202_v58 = vpop.f32.mrf.mxu0 }
 0x135   :  { %2459 = vst [vmem:[#allocation21_spill] sm:$0xff] %v2202_v58  ;;  %740 = vst [vmem:[#allocation2 + $0x1a8] sm:$0xff] %v2202_v58 }
 0x136   :  { %v2205_v59 = vpop.f32.mrf.mxu0 }
 0x137   :  { %2460 = vst [vmem:[#allocation22_spill] sm:$0xff] %v2205_v59  ;;  %739 = vst [vmem:[#allocation2 + $0x1a0] sm:$0xff] %v2205_v59 }
 0x138   :  { %v2208_v60 = vpop.f32.mrf.mxu0 }
 0x139   :  { %2461 = vst [vmem:[#allocation23_spill] sm:$0xff] %v2208_v60  ;;  %742 = vst [vmem:[#allocation2 + $0x1b8] sm:$0xff] %v2208_v60 }
 0x13a   :  { %v2211_v61 = vpop.f32.mrf.mxu0 }
 0x13b   :  { %2462 = vst [vmem:[#allocation24_spill] sm:$0xff] %v2211_v61  ;;  %741 = vst [vmem:[#allocation2 + $0x1b0] sm:$0xff] %v2211_v61 }
 0x13c   :  { %v2214_v62 = vpop.f32.mrf.mxu0 }
 0x13d   :  { %744 = vst [vmem:[#allocation2 + $0x1c8] sm:$0xff] %v2214_v62 }
 0x13e   :  { %v2217_v63 = vpop.f32.mrf.mxu0 }
 0x13f   :  { %743 = vst [vmem:[#allocation2 + $0x1c0] sm:$0xff] %v2217_v63 }
 0x140   :  { %v2220_v0 = vpop.f32.mrf.mxu0 }
 0x141   :  { %746 = vst [vmem:[#allocation2 + $0x1d8] sm:$0xff] %v2220_v0 }
 0x142   :  { %v2223_v1 = vpop.f32.mrf.mxu0 }
 0x143   :  { %745 = vst [vmem:[#allocation2 + $0x1d0] sm:$0xff] %v2223_v1 }
 0x144   :  { %v2226_v2 = vpop.f32.mrf.mxu0 }
 0x145   :  { %748 = vst [vmem:[#allocation2 + $0x1e8] sm:$0xff] %v2226_v2 }
 0x146   :  { %v2229_v3 = vpop.f32.mrf.mxu0 }
 0x147   :  { %747 = vst [vmem:[#allocation2 + $0x1e0] sm:$0xff] %v2229_v3 }
 0x148   :  { %v2232_v4 = vpop.f32.mrf.mxu0 }
 0x149   :  { %750 = vst [vmem:[#allocation2 + $0x1f8] sm:$0xff] %v2232_v4  ;;  %1427 = vmatprep.subr.mxu1 %v2232_v4 }
 0x14a   :  { %v2236_v5 = vpop.f32.mrf.mxu0  ;;  %1428 = vmatpush3.msra.mxu1 %v2181_v52 }
 0x14b   :  { %749 = vst [vmem:[#allocation2 + $0x1f0] sm:$0xff] %v2236_v5  ;;  %1429 = vmatprep.subr.mxu1 %v2236_v5 }
 0x14c   :  { %1430 = vmatpush3.msra.mxu1 %v2186_v53 }
 0x14d   :  { %1431 = vmatprep.subr.mxu1 %v2226_v2 }
 0x14e   :  { %1432 = vmatpush3.msra.mxu1 %v2171_v50 }
 0x14f   :  { %1433 = vmatprep.subr.mxu1 %v2229_v3 }
 0x150   :  { %1434 = vmatpush3.msra.mxu1 %v2176_v51 }
 0x151   :  { %1435 = vmatprep.subr.mxu1 %v2220_v0 }
 0x152   :  { %1436 = vmatpush3.msra.mxu1 %v2161_v48 }
 0x153   :  { %1437 = vmatprep.subr.mxu1 %v2223_v1 }
 0x154   :  { %1438 = vmatpush3.msra.mxu1 %v2166_v49 }
 0x155   :  { %1439 = vmatprep.subr.mxu1 %v2214_v62 }
 0x156   :  { %1440 = vmatpush3.msra.mxu1 %v2151_v46 }
 0x157   :  { %1441 = vmatprep.subr.mxu1 %v2217_v63 }
 0x158   :  { %1442 = vmatpush3.msra.mxu1 %v2156_v47 }
 0x159   :  { %1443 = vmatprep.subr.mxu1 %v2208_v60 }
 0x15a   :  { %1444 = vmatpush3.msra.mxu1 %v2141_v44 }
 0x15b   :  { %1445 = vmatprep.subr.mxu1 %v2211_v61 }
 0x15c   :  { %1446 = vmatpush3.msra.mxu1 %v2146_v45 }
 0x15d   :  { %1447 = vmatprep.subr.mxu1 %v2202_v58 }
 0x15e   :  { %1448 = vmatpush3.msra.mxu1 %v2131_v42  ;;  %v2463_v42 = vmov 1.0  }
 0x15f   :  { %1449 = vmatprep.subr.mxu1 %v2205_v59 }
 0x160   :  { %1450 = vmatpush3.msra.mxu1 %v2136_v43 }
 0x161   :  { %1451 = vmatprep.subr.mxu1 %v2196_v56 }
 0x162   :  { %1452 = vmatpush3.msra.mxu1 %v2121_v40 }
 0x163   :  { %1453 = vmatprep.subr.mxu1 %v2199_v57  ;;  %v905_v57 = vlaneseq }
 0x164   :  { %1454 = vmatpush3.msra.mxu1 %v2126_v41 }
 0x165   :  { %1455 = vmatprep.subr.mxu1 %v2190_v54  ;;  %v2272_v61 = vshrl.u32 %v905_v57, 7 }
 0x166   :  { %1456 = vmatpush3.msra.mxu1 %v2111_v38 }
 0x167   :  { %1457 = vmatprep.subr.mxu1 %v2193_v55  ;;  %v907_v38 = vsub.s32 0, %v2272_v61 }
 0x168   :  { %1458 = vmatpush3.msra.mxu1 %v2116_v39 }
 0x169   :  { %899 = vmatmul.mubr.f32.vlgmr.msra.gmra.mxu1 %v2463_v42 }
 0x16a   :  { %1101 = vmatprep.mubr.f32.mxu1 %v2463_v42 }
 0x1e9   :  { %v1424_v43 = vpop.f32.mrf.mxu1 }
 0x1eb   :  { %v1425_v56 = vpop.f32.mrf.mxu1 }
 0x1ec   :  { %v1426_v45 = vadd.f32 %v1425_v56, %v1424_v43 }
 0x229   :  { %v1459_v59 = vpop.f32.mrf.mxu1 }
 0x22b   :  { %v1460_v40 = vpop.f32.mrf.mxu1 }
 0x22c   :  { %v1461_v58 = vadd.f32 %v1460_v40, %v1459_v59 }
 0x22e   :  { %v901_v41 = vadd.f32 %v1461_v58, %v1426_v45 }
 0x230   :  { %v904_v54 = vmul.f32 0.001953125, %v901_v41 }
 0x232   :  { %v2277_v39 = vrot.slane %v904_v54, %v907_v38 }
 0x234   :  { %v924_v55 = vsub.f32 %v2054_v20, %v2277_v39  ;;  %v940_v44 = vsub.f32 %v2102_v36, %v2277_v39  ;;  %v939_v40 = vsub.f32 %v2106_v37, %v2277_v39  ;;  %v923_v41 = vsub.f32 %v2057_v21, %v2277_v39  ;;  %1189 = vst [vmem:[#allocation4] sm:$0xff] %v2277_v39 }
 0x235   :  { %v938_v45 = vsub.f32 %v2096_v34, %v2277_v39  ;;  %v922_v54 = vsub.f32 %v2048_v18, %v2277_v39  ;;  %v937_v20 = vsub.f32 %v2099_v35, %v2277_v39  ;;  %v920_v34 = vsub.f32 %v2042_v16, %v2277_v39 }
 0x236   :  { %v988_v60 = vmul.f32 %v924_v55, %v924_v55  ;;  %v1004_v43 = vmul.f32 %v940_v44, %v940_v44  ;;  %v1003_v36 = vmul.f32 %v939_v40, %v939_v40  ;;  %v921_v55 = vsub.f32 %v2051_v19, %v2277_v39 }
 0x237   :  { %v987_v37 = vmul.f32 %v923_v41, %v923_v41  ;;  %v936_v44 = vsub.f32 %v2090_v32, %v2277_v39  ;;  %v1002_v21 = vmul.f32 %v938_v45, %v938_v45  ;;  %v986_v56 = vmul.f32 %v922_v54, %v922_v54 }
 0x238   :  { %1462 = vmatprep.subr.mxu1 %v1004_v43  ;;  %v935_v18 = vsub.f32 %v2093_v33, %v2277_v39  ;;  %v1001_v35 = vmul.f32 %v937_v20, %v937_v20  ;;  %v919_v57 = vsub.f32 %v2045_v17, %v2277_v39  ;;  %v985_v19 = vmul.f32 %v921_v55, %v921_v55 }
 0x239   :  { %1463 = vmatpush3.msra.mxu1 %v988_v60  ;;  %v934_v32 = vsub.f32 %v2084_v30, %v2277_v39  ;;  %v1000_v58 = vmul.f32 %v936_v44, %v936_v44  ;;  %v918_v16 = vsub.f32 %v2036_v14, %v2277_v39  ;;  %v984_v59 = vmul.f32 %v920_v34, %v920_v34 }
 0x23a   :  { %1464 = vmatprep.subr.mxu1 %v1003_v36  ;;  %v933_v33 = vsub.f32 %v2087_v31, %v2277_v39  ;;  %v999_v60 = vmul.f32 %v935_v18, %v935_v18  ;;  %v917_v17 = vsub.f32 %v2039_v15, %v2277_v39  ;;  %v983_v40 = vmul.f32 %v919_v57, %v919_v57 }
 0x23b   :  { %1465 = vmatpush3.msra.mxu1 %v987_v37  ;;  %v932_v30 = vsub.f32 %v2078_v28, %v2277_v39  ;;  %v998_v43 = vmul.f32 %v934_v32, %v934_v32  ;;  %v916_v14 = vsub.f32 %v2030_v12, %v2277_v39  ;;  %v982_v41 = vmul.f32 %v918_v16, %v918_v16 }
 0x23c   :  { %1466 = vmatprep.subr.mxu1 %v1002_v21  ;;  %v931_v31 = vsub.f32 %v2081_v29, %v2277_v39  ;;  %v997_v45 = vmul.f32 %v933_v33, %v933_v33  ;;  %v915_v15 = vsub.f32 %v2033_v13, %v2277_v39  ;;  %v981_v54 = vmul.f32 %v917_v17, %v917_v17 }
 0x23d   :  { %1467 = vmatpush3.msra.mxu1 %v986_v56  ;;  %v930_v28 = vsub.f32 %v2072_v26, %v2277_v39  ;;  %v996_v20 = vmul.f32 %v932_v30, %v932_v30  ;;  %v914_v12 = vsub.f32 %v2024_v10, %v2277_v39  ;;  %v980_v36 = vmul.f32 %v916_v14, %v916_v14 }
 0x23e   :  { %1468 = vmatprep.subr.mxu1 %v1001_v35  ;;  %v929_v29 = vsub.f32 %v2075_v27, %v2277_v39  ;;  %v995_v55 = vmul.f32 %v931_v31, %v931_v31  ;;  %v913_v13 = vsub.f32 %v2027_v11, %v2277_v39  ;;  %v979_v37 = vmul.f32 %v915_v15, %v915_v15 }
 0x23f   :  { %1469 = vmatpush3.msra.mxu1 %v985_v19  ;;  %v928_v26 = vsub.f32 %v2066_v24, %v2277_v39  ;;  %v994_v44 = vmul.f32 %v930_v28, %v930_v28  ;;  %v912_v10 = vsub.f32 %v2018_v8, %v2277_v39  ;;  %v978_v21 = vmul.f32 %v914_v12, %v914_v12  ;;  %v2464_v28 = vld [vmem:[#allocation23_spill] sm:$0xff] }
 0x240   :  { %1470 = vmatprep.subr.mxu1 %v1000_v58  ;;  %v927_v27 = vsub.f32 %v2069_v25, %v2277_v39  ;;  %v993_v34 = vmul.f32 %v929_v29, %v929_v29  ;;  %v911_v11 = vsub.f32 %v2021_v9, %v2277_v39  ;;  %v977_v56 = vmul.f32 %v913_v13, %v913_v13  ;;  %v2465_v12 = vld [vmem:[#allocation15_spill] sm:$0xff]  ;;  %v2466_v29 = vld [vmem:[#allocation24_spill] sm:$0xff] }
 0x241   :  { %1471 = vmatpush3.msra.mxu1 %v984_v59  ;;  %v926_v24 = vsub.f32 %v2060_v22, %v2277_v39  ;;  %v992_v18 = vmul.f32 %v928_v26, %v928_v26  ;;  %v910_v8 = vsub.f32 %v2012_v6, %v2277_v39  ;;  %v976_v35 = vmul.f32 %v912_v10, %v912_v10  ;;  %v2467_v13 = vld [vmem:[#allocation16_spill] sm:$0xff]  ;;  %v2468_v26 = vld [vmem:[#allocation21_spill] sm:$0xff] }
 0x242   :  { %1472 = vmatprep.subr.mxu1 %v999_v60  ;;  %v925_v25 = vsub.f32 %v2063_v23, %v2277_v39  ;;  %v991_v57 = vmul.f32 %v927_v27, %v927_v27  ;;  %v909_v9 = vsub.f32 %v2015_v7, %v2277_v39  ;;  %v975_v19 = vmul.f32 %v911_v11, %v911_v11  ;;  %v2470_v11 = vld [vmem:[#allocation22_spill] sm:$0xff] }
 0x243   :  { %1473 = vmatpush3.msra.mxu1 %v983_v40  ;;  %v972_v22 = vsub.f32 %v2232_v4, %v2277_v39  ;;  %v990_v32 = vmul.f32 %v926_v24, %v926_v24  ;;  %v956_v6 = vsub.f32 %v2181_v52, %v2277_v39  ;;  %v974_v58 = vmul.f32 %v910_v8, %v910_v8 }
 0x244   :  { %1474 = vmatprep.subr.mxu1 %v998_v43  ;;  %v971_v23 = vsub.f32 %v2236_v5, %v2277_v39  ;;  %v989_v16 = vmul.f32 %v925_v25, %v925_v25  ;;  %v955_v7 = vsub.f32 %v2186_v53, %v2277_v39  ;;  %v973_v59 = vmul.f32 %v909_v9, %v909_v9  ;;  %v2472_v25 = vld [vmem:[#allocation19_spill] sm:$0xff] }
 0x245   :  { %1475 = vmatpush3.msra.mxu1 %v982_v41  ;;  %v970_v4 = vsub.f32 %v2226_v2, %v2277_v39  ;;  %v1036_v33 = vmul.f32 %v972_v22, %v972_v22  ;;  %v954_v52 = vsub.f32 %v2171_v50, %v2277_v39  ;;  %v1020_v60 = vmul.f32 %v956_v6, %v956_v6  ;;  %v2474_v6 = vld [vmem:[#allocation20_spill] sm:$0xff] }
 0x246   :  { %1476 = vmatprep.subr.mxu1 %v997_v45  ;;  %v969_v5 = vsub.f32 %v2229_v3, %v2277_v39  ;;  %v1035_v17 = vmul.f32 %v971_v23, %v971_v23  ;;  %v953_v53 = vsub.f32 %v2176_v51, %v2277_v39  ;;  %v1019_v40 = vmul.f32 %v955_v7, %v955_v7 }
 0x247   :  { %1477 = vmatpush3.msra.mxu1 %v981_v54  ;;  %v968_v2 = vsub.f32 %v2220_v0, %v2277_v39  ;;  %v1034_v50 = vmul.f32 %v970_v4, %v970_v4  ;;  %v952_v30 = vsub.f32 %v2161_v48, %v2277_v39  ;;  %v1018_v3 = vmul.f32 %v954_v52, %v954_v52  ;;  %v2476_v4 = vld [vmem:[#allocation17_spill] sm:$0xff] }
 0x248   :  { %1478 = vmatprep.subr.mxu1 %v996_v20  ;;  %v967_v43 = vsub.f32 %v2223_v1, %v2277_v39  ;;  %v1033_v14 = vmul.f32 %v969_v5, %v969_v5  ;;  %v951_v51 = vsub.f32 %v2166_v49, %v2277_v39  ;;  %v1017_v41 = vmul.f32 %v953_v53, %v953_v53  ;;  %v2478_v53 = vld [vmem:[#allocation18_spill] sm:$0xff] }
 0x249   :  { %1479 = vmatpush3.msra.mxu1 %v980_v36  ;;  %v966_v0 = vsub.f32 %v2214_v62, %v2277_v39  ;;  %v1032_v31 = vmul.f32 %v968_v2, %v968_v2  ;;  %v950_v48 = vsub.f32 %v2151_v46, %v2277_v39  ;;  %v1016_v45 = vmul.f32 %v952_v30, %v952_v30 }
 0x24a   :  { %1480 = vmatprep.subr.mxu1 %v995_v55  ;;  %v965_v1 = vsub.f32 %v2217_v63, %v2277_v39  ;;  %v1031_v15 = vmul.f32 %v967_v43, %v967_v43  ;;  %v949_v49 = vsub.f32 %v2156_v47, %v2277_v39  ;;  %v1015_v54 = vmul.f32 %v951_v51, %v951_v51 }
 0x24b   :  { %1481 = vmatpush3.msra.mxu1 %v979_v37  ;;  %v964_v62 = vsub.f32 %v2464_v28, %v2277_v39  ;;  %v1030_v20 = vmul.f32 %v966_v0, %v966_v0  ;;  %v948_v46 = vsub.f32 %v2465_v12, %v2277_v39  ;;  %v1014_v36 = vmul.f32 %v950_v48, %v950_v48 }
 0x24c   :  { %1482 = vmatprep.subr.mxu1 %v994_v44  ;;  %v963_v63 = vsub.f32 %v2466_v29, %v2277_v39  ;;  %v1029_v55 = vmul.f32 %v965_v1, %v965_v1  ;;  %v947_v47 = vsub.f32 %v2467_v13, %v2277_v39  ;;  %v1013_v37 = vmul.f32 %v949_v49, %v949_v49 }
 0x24d   :  { %1483 = vmatpush3.msra.mxu1 %v978_v21  ;;  %v962_v44 = vsub.f32 %v2468_v26, %v2277_v39  ;;  %v1028_v10 = vmul.f32 %v964_v62, %v964_v62  ;;  %v2469_v21 = vld [vmem:[#allocation13_spill] sm:$0xff] }
 0x24e   :  { %1484 = vmatprep.subr.mxu1 %v993_v34  ;;  %v946_v27 = vsub.f32 %v2469_v21, %v2277_v39  ;;  %v1012_v34 = vmul.f32 %v948_v46, %v948_v46  ;;  %v1027_v24 = vmul.f32 %v963_v63, %v963_v63 }
 0x24f   :  { %1485 = vmatpush3.msra.mxu1 %v977_v56  ;;  %v961_v56 = vsub.f32 %v2470_v11, %v2277_v39  ;;  %v1026_v9 = vmul.f32 %v962_v44, %v962_v44 }
 0x250   :  { %1486 = vmatprep.subr.mxu1 %v992_v18  ;;  %v2471_v18 = vld [vmem:[#allocation14_spill] sm:$0xff] }
 0x251   :  { %1487 = vmatpush3.msra.mxu1 %v976_v35  ;;  %v945_v8 = vsub.f32 %v2471_v18, %v2277_v39  ;;  %v1011_v35 = vmul.f32 %v947_v47, %v947_v47  ;;  %v1025_v23 = vmul.f32 %v961_v56, %v961_v56 }
 0x252   :  { %1488 = vmatprep.subr.mxu1 %v991_v57  ;;  %v960_v57 = vsub.f32 %v2472_v25, %v2277_v39 }
 0x253   :  { %1489 = vmatpush3.msra.mxu1 %v975_v19  ;;  %v2473_v19 = vld [vmem:[#allocation11_spill] sm:$0xff] }
 0x254   :  { %1490 = vmatprep.subr.mxu1 %v990_v32  ;;  %v944_v22 = vsub.f32 %v2473_v19, %v2277_v39  ;;  %v1010_v32 = vmul.f32 %v946_v27, %v946_v27  ;;  %v1024_v52 = vmul.f32 %v960_v57, %v960_v57 }
 0x255   :  { %1491 = vmatpush3.msra.mxu1 %v974_v58  ;;  %v959_v58 = vsub.f32 %v2474_v6, %v2277_v39 }
 0x256   :  { %1492 = vmatprep.subr.mxu1 %v989_v16  ;;  %v2475_v16 = vld [vmem:[#allocation12_spill] sm:$0xff] }
 0x257   :  { %1493 = vmatpush3.msra.mxu1 %v973_v59  ;;  %v943_v7 = vsub.f32 %v2475_v16, %v2277_v39  ;;  %v1009_v59 = vmul.f32 %v945_v8, %v945_v8  ;;  %v1023_v2 = vmul.f32 %v959_v58, %v959_v58 }
 0x258   :  { %1102 = vmatmul.mubr.f32.vlgmr.msra.gmra.mxu1 %v2463_v42  ;;  %1497 = vmatprep.subr.mxu1 %v1036_v33  ;;  %v958_v33 = vsub.f32 %v2476_v4, %v2277_v39 }
 0x259   :  { %1498 = vmatpush3.msra.mxu1 %v1020_v60  ;;  %1171 = vmatprep.mubr.f32.mxu1 %v2463_v42  ;;  %v2477_v60 = vld [vmem:[#allocation9_spill] sm:$0xff] }
 0x25a   :  { %1499 = vmatprep.subr.mxu1 %v1035_v17  ;;  %v942_v5 = vsub.f32 %v2477_v60, %v2277_v39  ;;  %v1008_v17 = vmul.f32 %v944_v22, %v944_v22  ;;  %v1022_v43 = vmul.f32 %v958_v33, %v958_v33 }
 0x25b   :  { %1500 = vmatpush3.msra.mxu1 %v1019_v40  ;;  %v957_v40 = vsub.f32 %v2478_v53, %v2277_v39 }
 0x25c   :  { %1501 = vmatprep.subr.mxu1 %v1034_v50  ;;  %v2479_v50 = vld [vmem:[#allocation10_spill] sm:$0xff] }
 0x25d   :  { %1502 = vmatpush3.msra.mxu1 %v1018_v3  ;;  %v941_v30 = vsub.f32 %v2479_v50, %v2277_v39  ;;  %v1007_v3 = vmul.f32 %v943_v7, %v943_v7  ;;  %v1021_v51 = vmul.f32 %v957_v40, %v957_v40 }
 0x25e   :  { %1503 = vmatprep.subr.mxu1 %v1033_v14  ;;  %v1006_v14 = vmul.f32 %v942_v5, %v942_v5 }
 0x25f   :  { %1504 = vmatpush3.msra.mxu1 %v1017_v41  ;;  %v1005_v41 = vmul.f32 %v941_v30, %v941_v30 }
 0x260   :  { %1505 = vmatprep.subr.mxu1 %v1032_v31 }
 0x261   :  { %1506 = vmatpush3.msra.mxu1 %v1016_v45 }
 0x262   :  { %1507 = vmatprep.subr.mxu1 %v1031_v15 }
 0x263   :  { %1508 = vmatpush3.msra.mxu1 %v1015_v54 }
 0x264   :  { %1509 = vmatprep.subr.mxu1 %v1030_v20 }
 0x265   :  { %1510 = vmatpush3.msra.mxu1 %v1014_v36 }
 0x266   :  { %1511 = vmatprep.subr.mxu1 %v1029_v55 }
 0x267   :  { %1512 = vmatpush3.msra.mxu1 %v1013_v37 }
 0x268   :  { %1513 = vmatprep.subr.mxu1 %v1028_v10 }
 0x269   :  { %1514 = vmatpush3.msra.mxu1 %v1012_v34 }
 0x26a   :  { %1515 = vmatprep.subr.mxu1 %v1027_v24 }
 0x26b   :  { %1516 = vmatpush3.msra.mxu1 %v1011_v35 }
 0x26c   :  { %1517 = vmatprep.subr.mxu1 %v1026_v9 }
 0x26d   :  { %1518 = vmatpush3.msra.mxu1 %v1010_v32 }
 0x26e   :  { %1519 = vmatprep.subr.mxu1 %v1025_v23 }
 0x26f   :  { %1520 = vmatpush3.msra.mxu1 %v1009_v59 }
 0x270   :  { %1521 = vmatprep.subr.mxu1 %v1024_v52 }
 0x271   :  { %1522 = vmatpush3.msra.mxu1 %v1008_v17 }
 0x272   :  { %1523 = vmatprep.subr.mxu1 %v1023_v2 }
 0x273   :  { %1524 = vmatpush3.msra.mxu1 %v1007_v3 }
 0x274   :  { %1525 = vmatprep.subr.mxu1 %v1022_v43 }
 0x275   :  { %1526 = vmatpush3.msra.mxu1 %v1006_v14 }
 0x276   :  { %1527 = vmatprep.subr.mxu1 %v1021_v51 }
 0x277   :  { %1528 = vmatpush3.msra.mxu1 %v1005_v41 }
 0x278   :  { %1172 = vmatmul.mubr.f32.vlgmr.msra.gmra.mxu1 %v2463_v42 }
 0x279   :  { %1656 = shalt.err (!%p1653_p4)
}
 0x27a   :  { %1231 = dma.vmem_to_hbm [thread:$0]  %s1229_s18, 128, %s2427_s3, [#allocation5]  }
 0x27b   :  { %s1665_s24 = scalar_lea.vmem %s1216_s20, 8192  ;;  %p1670_p6 = scmp.lt.s32.totalorder %s1216_s20, %s1216_s20 }
 0x27c   :  { %p1666_p5 = scmp.ne.s32.totalorder %s1216_s20, %s1665_s24  ;;  %p1671_p7 = scmp.lt.s32.totalorder %s1665_s24, %s1665_s24 }
 0x27e   :  { %p1672_p8 = por %p1671_p7, %p1670_p6 }
 0x280   :  { %p1673_p9 = pnand %p1672_p8, %p1666_p5 }
 0x282   :  { %1676 = shalt.err (!%p1673_p9)
}
 0x283   :  { %s1712_s25 = smov 128   ;;  %s1713_s26 = smov 8   ;;  %v1196_v49 = vmul.f32 %v2277_v39, %v2277_v39 }
 0x284   :  { %1221 = dma.vmem_to_hbm [thread:$0]  %s1216_s20, 8192, %s2426_s2, [#allocation3], %s1712_s25, %s1712_s25, %s1713_s26  }
 0x285   :  { %s1714_s3 = smov [#allocation6]   ;;  %v1203_v28 = vmul.f32 0.0, %v1196_v49 }
 0x286   :  { %s1238_s29 = sshll.u32 %s1714_s3, 4  ;;  %s1239_s29 = int_to_ptr.vmem [resolvable:$true] %s1238_s29 }
 0x287   :  { %s1685_s2 = scalar_lea.vmem %s1239_s29, 128  ;;  %p1690_p11 = scmp.lt.s32.totalorder %s1239_s29, %s1239_s29 }
 0x288   :  { %p1686_p10 = scmp.ne.s32.totalorder %s1239_s29, %s1685_s2  ;;  %p1691_p12 = scmp.lt.s32.totalorder %s1685_s2, %s1685_s2 }
 0x28a   :  { %p1692_p13 = por %p1691_p12, %p1690_p11 }
 0x28c   :  { %p1693_p0 = pnand %p1692_p13, %p1686_p10 }
 0x318   :  { %v1494_v42 = vpop.f32.mrf.mxu1 }
 0x31a   :  { %v1495_v0 = vpop.f32.mrf.mxu1 }
 0x31b   :  { %v1496_v45 = vadd.f32 %v1495_v0, %v1494_v42 }
 0x338   :  { %v1529_v31 = vpop.f32.mrf.mxu1 }
 0x33a   :  { %v1530_v48 = vpop.f32.mrf.mxu1 }
 0x33b   :  { %v1531_v1 = vadd.f32 %v1530_v48, %v1529_v31 }
 0x33d   :  { %v1174_v15 = vadd.f32 %v1531_v1, %v1496_v45 }
 0x33f   :  { %v1194_v54 = vrot.slane %v1174_v15, %v907_v38 }
 0x341   :  { %v1204_v62 = vadd.f32 %v1203_v28, %v1194_v54 }
 0x343   :  { %1205 = vst [vmem:[#allocation6] sm:$0xff] %v1204_v62 }
 0x344   :  { %1696 = shalt.err (!%p1693_p0)
}
 0x345   :  { %1241 = dma.vmem_to_hbm [thread:$0]  %s1239_s29, 128, %s2428_s4, [#allocation5]  }
 0x346   :  { %1705 = dma.done.wait [#allocation3], 8192  }
 0x347   :  { %1706 = vsyncadd [#allocation3], 4294959104 }
 0x348   :  { %1707 = dma.done.wait [#allocation5], 256  }
 0x349   :  { %1708 = vsyncadd [#allocation5], 4294967040 }
 0x34a   :  { %1251 = vsyncpa [#allocation3], 1 }
 0x34b   :  { %1252 = vsyncpa [#allocation5], 1 }

</bundles_post_ra>
